<compile_context>
chip_gen: v6e
topology: v6e:2x2x1
jax: 0.10.0
libtpu: 0.0.40
codegen_flags: <defaults>
</compile_context>

<pallas_src>
import jax
import jax.numpy as jnp
from jax.experimental import pallas as pl
from jax.experimental.pallas import tpu as pltpu


def additive_attn_kernel(h_ref, wu_ref, bu_ref, wa_ref, out_ref):
    # h_ref : (Bt, S, D)   batch tile, full sequence, full feature dim
    # wu_ref: (D, H)       linear_u.weight, pre-transposed, in h's dtype
    # bu_ref: (1, H)       linear_u.bias   (f32)
    # wa_ref: (1, H)       linear_a.weight (f32)
    # out_ref: (Bt, D)     lane-dense output slab
    bt, s_len, d = h_ref.shape

    h = h_ref[...]                                   # (Bt, S, D), storage dtype
    h2 = h.reshape(bt * s_len, d)                    # (Bt*S, D): one MXU slab
                                                     # (lane dim preserved -> layout no-op when S%8==0)

    # u = tanh(h @ Wu^T + bu): single matmul over all Bt*S rows, f32 accumulate.
    u = jnp.tanh(
        jnp.dot(h2, wu_ref[...], preferred_element_type=jnp.float32)
        + bu_ref[...]
    )                                                # (Bt*S, H) f32

    # scores = linear_a(u): elementwise mul + lane reduce (avoids a degenerate
    # (H, 1) matmul).
    scores = jnp.sum(u * wa_ref[...], axis=-1, keepdims=True)   # (Bt*S, 1)
    scores = scores.reshape(bt, s_len, 1)                       # (Bt, S, 1)

    # Numerically stable softmax over the sequence axis (torch dim=1), with the
    # divide pushed to the EUP slot.
    m = jnp.max(scores, axis=1, keepdims=True)                  # (Bt, 1, 1)
    e = jnp.exp(scores - m)
    denom = jnp.sum(e, axis=1, keepdims=True)                   # (Bt, 1, 1)
    a = e * pl.reciprocal(denom, approx=True)                   # (Bt, S, 1)

    # s = sum_s a[b, s] * h[b, s, :]  -> (Bt, D).  Sublane reduce; neutral vs.
    # MXU at S=8 (per review), revisit for large S.
    s = jnp.sum(a * h.astype(jnp.float32), axis=1)
    out_ref[...] = s.astype(out_ref.dtype)


def additive_attention(h, wu, bu, wa, *, max_block_bytes=4 * 1024 * 1024):
    """h: (B, S, D); wu: (H, D) torch layout; bu: (H,); wa: (1, H)."""
    B, S, D = h.shape
    H = wu.shape[0]
    out_dtype = h.dtype

    # Weights are tiny (a few KiB): Wu in h's dtype so the MXU sees bf16 on
    # v6e/v7x when h is bf16; bias / wa in f32 for the elementwise path.
    wu_t = jnp.asarray(wu).T.astype(h.dtype)             # (D, H)
    bu_r = jnp.asarray(bu).reshape(1, H).astype(jnp.float32)
    wa_r = jnp.asarray(wa).reshape(1, H).astype(jnp.float32)

    # Batch tile: as many rows per grid step as a few MiB of VMEM allows
    # (Pallas double-buffers the block; budget chosen to also fit v7x's 64 MiB).
    row_bytes = S * D * h.dtype.itemsize
    bt = max(1, max_block_bytes // row_bytes)
    if bt >= B:
        bt = B
        b_pad = B
    else:
        bt = max(8, (bt // 8) * 8)                       # sublane-friendly out blocks
        b_pad = pl.cdiv(B, bt) * bt
        if b_pad != B:
            # Zero padding is safe: padded rows produce a finite softmax and a
            # zero weighted sum; they are sliced off below.
            h = jnp.pad(h, ((0, b_pad - B), (0, 0), (0, 0)))

    grid = (b_pad // bt,)

    out = pl.pallas_call(
        additive_attn_kernel,
        out_shape=jax.ShapeDtypeStruct((b_pad, D), out_dtype),
        grid_spec=pltpu.PrefetchScalarGridSpec(
            num_scalar_prefetch=0,
            grid=grid,
            in_specs=[
                pl.BlockSpec((bt, S, D), lambda i: (i, 0, 0)),
                pl.BlockSpec((D, H), lambda i: (0, 0)),
                pl.BlockSpec((1, H), lambda i: (0, 0)),
                pl.BlockSpec((1, H), lambda i: (0, 0)),
            ],
            out_specs=pl.BlockSpec((bt, D), lambda i: (i, 0)),
        ),
        compiler_params=pltpu.CompilerParams(
            dimension_semantics=("parallel",),
        ),
    )(h, wu_t, bu_r, wa_r)
    return out[:B]


def additive_attention_ref(h, wu, bu, wa):
    u = jnp.tanh(jnp.einsum("bsd,hd->bsh", h, wu) + bu)
    scores = jnp.einsum("bsh,oh->bso", u, wa)            # (B, S, 1)
    a = jax.nn.softmax(scores, axis=1)
    return jnp.sum(a * h, axis=1)


if __name__ == "__main__":
    D_in, H, S = 32, 32, 8

    key = jax.random.PRNGKey(0)
    k_h, k_wu, k_bu, k_wa, k_h2 = jax.random.split(key, 5)

    # Synthetic parameters with nn.Linear shapes from __init__.
    wu = jax.random.normal(k_wu, (H, D_in), dtype=jnp.float32) * 0.1   # linear_u.weight
    bu = jax.random.normal(k_bu, (H,), dtype=jnp.float32) * 0.1        # linear_u.bias
    wa = jax.random.normal(k_wa, (1, H), dtype=jnp.float32) * 0.1      # linear_a.weight

    # Case 1: small batch (whole batch in a single grid step).
    h = jax.random.normal(k_h, (2, S, D_in), dtype=jnp.float32)
    out = jax.block_until_ready(additive_attention(h, wu, bu, wa))
    ref = additive_attention_ref(h, wu, bu, wa)
    assert out.shape == (2, D_in)
    # Tolerance relaxed slightly for the approximate (EUP) softmax reciprocal.
    assert jnp.allclose(out, ref, atol=2e-3, rtol=2e-3), "mismatch vs reference (B=2)"

    # Case 2: larger batch slab (still one lane/sublane-dense block per step).
    h_big = jax.random.normal(k_h2, (16, S, D_in), dtype=jnp.float32)
    out_big = jax.block_until_ready(additive_attention(h_big, wu, bu, wa))
    ref_big = additive_attention_ref(h_big, wu, bu, wa)
    assert out_big.shape == (16, D_in)
    assert jnp.allclose(out_big, ref_big, atol=2e-3, rtol=2e-3), "mismatch vs reference (B=16)"

    print("KERNEL_OK")
</pallas_src>

<mosaic_0001>
module attributes {stable_mosaic.version = 11 : i64} {
  func.func @additive_attn_kernel(%arg0: i32, %arg1: memref<2x8x32xf32, #tpu.memory_space<vmem>>, %arg2: memref<32x32xf32, #tpu.memory_space<vmem>>, %arg3: memref<1x32xf32, #tpu.memory_space<vmem>>, %arg4: memref<1x32xf32, #tpu.memory_space<vmem>>, %arg5: memref<2x32xf32, #tpu.memory_space<vmem>>) attributes {dimension_semantics = [#tpu.dimension_semantics<parallel>], iteration_bounds = array<i64: 1>, scalar_prefetch = 0 : i64, scratch_operands = 0 : i64, tpu.core_type = #tpu.core_type<tc>, window_params = [{transform_indices = @transform_0, window_bounds = array<i64: 2, 8, 32>}, {pipeline_mode = #tpu.pipeline_mode<synchronous>, transform_indices = @transform_1, window_bounds = array<i64: 32, 32>}, {pipeline_mode = #tpu.pipeline_mode<synchronous>, transform_indices = @transform_2, window_bounds = array<i64: 1, 32>}, {pipeline_mode = #tpu.pipeline_mode<synchronous>, transform_indices = @transform_3, window_bounds = array<i64: 1, 32>}, {transform_indices = @transform_4, window_bounds = array<i64: 2, 32>}]} {
    %c0 = arith.constant 0 : index
    %c0_0 = arith.constant 0 : index
    %c0_1 = arith.constant 0 : index
    %0 = vector.load %arg1[%c0, %c0_0, %c0_1] : memref<2x8x32xf32, #tpu.memory_space<vmem>>, vector<2x8x32xf32>
    %1 = vector.shape_cast %0 : vector<2x8x32xf32> to vector<16x32xf32>
    %c0_2 = arith.constant 0 : index
    %c0_3 = arith.constant 0 : index
    %2 = vector.load %arg2[%c0_2, %c0_3] : memref<32x32xf32, #tpu.memory_space<vmem>>, vector<32x32xf32>
    %cst = arith.constant dense<0.000000e+00> : vector<16x32xf32>
    %3 = tpu.matmul %1, %2, %cst {dimension_numbers = #tpu.dot_dimension_numbers<[1], [0], [0], [1], [0, 0, 1, 1], [], []>} : vector<16x32xf32>, vector<32x32xf32>, vector<16x32xf32> -> vector<16x32xf32>
    %c0_4 = arith.constant 0 : index
    %c0_5 = arith.constant 0 : index
    %4 = vector.load %arg3[%c0_4, %c0_5] : memref<1x32xf32, #tpu.memory_space<vmem>>, vector<1x32xf32>
    %5 = vector.broadcast %4 : vector<1x32xf32> to vector<16x32xf32>
    %6 = arith.addf %3, %5 : vector<16x32xf32>
    %7 = math.tanh %6 : vector<16x32xf32>
    %c0_6 = arith.constant 0 : index
    %c0_7 = arith.constant 0 : index
    %8 = vector.load %arg4[%c0_6, %c0_7] : memref<1x32xf32, #tpu.memory_space<vmem>>, vector<1x32xf32>
    %9 = vector.broadcast %8 : vector<1x32xf32> to vector<16x32xf32>
    %10 = arith.mulf %7, %9 : vector<16x32xf32>
    %cst_8 = arith.constant dense<0.000000e+00> : vector<16xf32>
    %11 = vector.multi_reduction <add>, %10, %cst_8 [1] : vector<16x32xf32> to vector<16xf32>
    %12 = vector.shape_cast %11 : vector<16xf32> to vector<16x1xf32>
    %13 = vector.shape_cast %12 : vector<16x1xf32> to vector<2x8x1xf32>
    %cst_9 = arith.constant dense<0xFF800000> : vector<2x1xf32>
    %14 = vector.multi_reduction <maximumf>, %13, %cst_9 [1] : vector<2x8x1xf32> to vector<2x1xf32>
    %15 = vector.shape_cast %14 : vector<2x1xf32> to vector<2x1x1xf32>
    %16 = vector.broadcast %15 : vector<2x1x1xf32> to vector<2x8x1xf32>
    %17 = arith.subf %13, %16 : vector<2x8x1xf32>
    %18 = math.exp %17 : vector<2x8x1xf32>
    %cst_10 = arith.constant dense<0.000000e+00> : vector<2x1xf32>
    %19 = vector.multi_reduction <add>, %18, %cst_10 [1] : vector<2x8x1xf32> to vector<2x1xf32>
    %20 = vector.shape_cast %19 : vector<2x1xf32> to vector<2x1x1xf32>
    %21 = tpu.reciprocal %20 {approx = true} : vector<2x1x1xf32> -> vector<2x1x1xf32>
    %22 = vector.broadcast %21 : vector<2x1x1xf32> to vector<2x8x1xf32>
    %23 = arith.mulf %18, %22 : vector<2x8x1xf32>
    %24 = vector.broadcast %23 : vector<2x8x1xf32> to vector<2x8x32xf32>
    %25 = arith.mulf %24, %0 : vector<2x8x32xf32>
    %cst_11 = arith.constant dense<0.000000e+00> : vector<2x32xf32>
    %26 = vector.multi_reduction <add>, %25, %cst_11 [1] : vector<2x8x32xf32> to vector<2x32xf32>
    %c0_12 = arith.constant 0 : index
    %c0_13 = arith.constant 0 : index
    %27 = vector.load %arg5[%c0_12, %c0_13] : memref<2x32xf32, #tpu.memory_space<vmem>>, vector<2x32xf32>
    tpu.vector_store %arg5[%c0_12, %c0_13], %26 {strides = array<i32>} : memref<2x32xf32, #tpu.memory_space<vmem>>, vector<2x32xf32>,
    return
  }
  func.func @transform_0(%arg0: i32) -> (i32, i32, i32) {
    %c0_i32 = arith.constant 0 : i32
    %c0_i32_0 = arith.constant 0 : i32
    %c0_i32_1 = arith.constant 0 : i32
    return %arg0, %c0_i32, %c0_i32_0 : i32, i32, i32
  }
  func.func @transform_1(%arg0: i32) -> (i32, i32) {
    %c0_i32 = arith.constant 0 : i32
    %c0_i32_0 = arith.constant 0 : i32
    %c0_i32_1 = arith.constant 0 : i32
    return %c0_i32, %c0_i32_0 : i32, i32
  }
  func.func @transform_2(%arg0: i32) -> (i32, i32) {
    %c0_i32 = arith.constant 0 : i32
    %c0_i32_0 = arith.constant 0 : i32
    %c0_i32_1 = arith.constant 0 : i32
    return %c0_i32, %c0_i32_0 : i32, i32
  }
  func.func @transform_3(%arg0: i32) -> (i32, i32) {
    %c0_i32 = arith.constant 0 : i32
    %c0_i32_0 = arith.constant 0 : i32
    %c0_i32_1 = arith.constant 0 : i32
    return %c0_i32, %c0_i32_0 : i32, i32
  }
  func.func @transform_4(%arg0: i32) -> (i32, i32) {
    %c0_i32 = arith.constant 0 : i32
    %c0_i32_0 = arith.constant 0 : i32
    return %arg0, %c0_i32 : i32, i32
  }
}

</mosaic_0001>

<bundles_post_ra>
// kernel: tpu_custom_call.1
= control target key start
LH: loop header
LB: loop body
LE: loop exit
PB: predicated region body
PF: predicated region fallthrough
CT: control target
= control target key end

     0   :  { %9 = vsyncpa [#allocation3], 0  ;;  %s394_s0 = inlined_call_operand.hbm [shape: f32[2,8,32], index: 0, kind: input, shape index: {}]   ;;  %s395_s1 = inlined_call_operand.hbm [shape: f32[32,32], index: 1, kind: input, shape index: {}]   ;;  %s396_s2 = inlined_call_operand.vmem [shape: f32[1,32], index: 2, kind: input, shape index: {}]   ;;  %s397_s3 = inlined_call_operand.vmem [shape: f32[1,32], index: 3, kind: input, shape index: {}]   ;;  %s398_s4 = inlined_call_operand.hbm [shape: f32[2,32], index: 4, kind: output, shape index: {}]  }
   0x1   :  { %10 = vsyncpa [#allocation6], 0 }
   0x2   :  { %11 = vsyncpa [#allocation4], 0  ;;  %s335_s15 = smov [#allocation2]  }
   0x3   :  { %s17_s16 = sshll.u32 %s335_s15, 4  ;;  %s18_s16 = int_to_ptr.vmem [resolvable:$true] %s17_s16 }
   0x4   :  { %s277_s17 = scalar_lea.vmem %s18_s16, 256  ;;  %p282_p1 = scmp.lt.s32.totalorder %s18_s16, %s18_s16 }
   0x5   :  { %p278_p0 = scmp.ne.s32.totalorder %s18_s16, %s277_s17  ;;  %p283_p2 = scmp.lt.s32.totalorder %s277_s17, %s277_s17 }
   0x7   :  { %p284_p3 = por %p283_p2, %p282_p1 }
   0x9   :  { %p285_p4 = pnand %p284_p3, %p278_p0 }
   0xb   :  { %288 = shalt.err (!%p285_p4)
}
   0xc   :  { %s336_s18 = smov 128   ;;  %s337_s19 = smov 8  }
   0xd   :  { %23 = dma.hbm_to_vmem [thread:$0]  %s394_s0, 256, %s18_s16, [#allocation3], %s336_s18, %s336_s18, %s337_s19  }
   0xe   :  { %s338_s22 = smov [#allocation5]  }
   0xf   :  { %s29_s23 = sshll.u32 %s338_s22, 4  ;;  %s30_s23 = int_to_ptr.vmem [resolvable:$true] %s29_s23 }
  0x10   :  { %s297_s24 = scalar_lea.vmem %s30_s23, 512  ;;  %p302_p6 = scmp.lt.s32.totalorder %s30_s23, %s30_s23 }
  0x11   :  { %p298_p5 = scmp.ne.s32.totalorder %s30_s23, %s297_s24  ;;  %p303_p7 = scmp.lt.s32.totalorder %s297_s24, %s297_s24 }
  0x13   :  { %p304_p8 = por %p303_p7, %p302_p6 }
  0x15   :  { %p305_p9 = pnand %p304_p8, %p298_p5 }
  0x17   :  { %308 = shalt.err (!%p305_p9)
}
  0x18   :  { %35 = dma.hbm_to_vmem [thread:$0]  %s395_s1, 512, %s30_s23, [#allocation6], %s336_s18, %s336_s18, %s337_s19  }
  0x19   :  { %329 = dma.done.wait [#allocation3], 256  }
  0x1a   :  { %330 = vsyncadd [#allocation3], 4294967040 }
  0x1b   :  { %331 = dma.done.wait [#allocation6], 512  }
  0x1c   :  { %332 = vsyncadd [#allocation6], 4294966784  ;;  %vm59_vm0 = vcmask 261120   ;;  %v51_v0 = vld [vmem:[#allocation5 + $0x18] sm:$0xff]  ;;  %v50_v1 = vld [vmem:[#allocation5 + $0x10] sm:$0xff]  ;;  %vm210_vm1 = vcmask 1041409  }
  0x1d   :  { %241 = vmatprep.subr.mxu0 %v51_v0  ;;  %v371_v2 = vld [vmem:[#allocation2] sm:$0xff]  ;;  %v49_v3 = vld [vmem:[#allocation5 + $0x8] sm:$0xff]  ;;  %v48_v4 = vld [vmem:[#allocation5] sm:$0xff]  ;;  %vm213_vm2 = vcmask 254976  }
  0x1e   :  { %242 = vmatpush3.msra.mxu0 %v51_v0  ;;  %249 = vmatprep.mubr.msk.f32.mxu0 %vm59_vm0, %v371_v2  ;;  %v375_v5 = vld [vmem:[#allocation2 + $0x8] sm:$0xff]  ;;  %v231_v6 = vld [vmem:[%s396_s2] ss:$0 sm:$0xff]  ;;  %s339_s2 = smov [#allocation7]  }
  0x1f   :  { %243 = vmatprep.subr.mxu0 %v50_v1  ;;  %v234_v13 = vld [vmem:[%s397_s3] ss:$0 sm:$0xff]  ;;  %s221_s3 = sshll.u32 %s339_s2, 4  ;;  %s222_s3 = int_to_ptr.vmem [resolvable:$true] %s221_s3 }
  0x20   :  { %244 = vmatpush3.msra.mxu0 %v50_v1  ;;  %s309_s29 = scalar_lea.vmem %s222_s3, 32  ;;  %p314_p11 = scmp.lt.s32.totalorder %s222_s3, %s222_s3 }
  0x21   :  { %245 = vmatprep.subr.mxu0 %v49_v3  ;;  %p310_p10 = scmp.ne.s32.totalorder %s222_s3, %s309_s29  ;;  %p315_p12 = scmp.lt.s32.totalorder %s309_s29, %s309_s29 }
  0x22   :  { %246 = vmatpush3.msra.mxu0 %v49_v3 }
  0x23   :  { %247 = vmatprep.subr.mxu0 %v48_v4  ;;  %p316_p13 = por %p315_p12, %p314_p11 }
  0x24   :  { %248 = vmatpush3.msra.mxu0 %v48_v4 }
  0x25   :  { %250 = vmatmul.mubr.msk.f32.vlgmr.msra.gmra.mxu0 %vm59_vm0, %v375_v5  ;;  %p317_p0 = pnand %p316_p13, %p310_p10 }
  0xe5   :  { %v251_v7 = vpop.f32.mrf.mxu0 }
  0xe6   :  { %v138_v8 = vadd.f32 %v251_v7, %v231_v6 }
  0xe7   :  { %v132_v9 = vpop.f32.mrf.mxu0 }
  0xe8   :  { %v133_v10 = vadd.f32 %v231_v6, %v132_v9  ;;  %257 = vtanh.f32 %v138_v8 }
  0xea   :  { %259 = vtanh.f32 %v133_v10 }
  0xf5   :  { %v258_v11 = vpop.eup %257 }
  0xf6   :  { %v151_v16 = vmul.f32 %v258_v11, %v234_v13 }
  0xf7   :  { %v260_v12 = vpop.eup %259 }
  0xf8   :  { %v150_v14 = vmul.f32 %v260_v12, %v234_v13  ;;  %v155_v17 = vsel %vm59_vm0, %v151_v16, 0.0 }
  0xfa   :  { %v152_v15 = vsel %vm59_vm0, %v150_v14, 0.0 }
  0xfb   :  { %153 = vadd.xlane.f32.xlu0 %v152_v15 }
  0xff   :  { %156 = vadd.xlane.f32.xlu0 %v155_v17 }
 0x184   :  { %v154_v18 = vpop.xlane.xlu0 %153 }
 0x185   :  { %v158_v19 = vrot.slane %v154_v18, 4 }
 0x187   :  { %v159_v20 = vmax.f32 %v154_v18, %v158_v19 }
 0x188   :  { %v157_v21 = vpop.xlane.xlu0 %156 }
 0x189   :  { %v160_v22 = vrot.slane %v159_v20, 2  ;;  %v164_v23 = vrot.slane %v157_v21, 4 }
 0x18b   :  { %v161_v24 = vmax.f32 %v159_v20, %v160_v22  ;;  %v165_v25 = vmax.f32 %v157_v21, %v164_v23 }
 0x18d   :  { %v162_v26 = vrot.slane %v161_v24, 1  ;;  %v166_v27 = vrot.slane %v165_v25, 2 }
 0x18f   :  { %v163_v28 = vmax.f32 %v161_v24, %v162_v26  ;;  %v167_v29 = vmax.f32 %v165_v25, %v166_v27 }
 0x191   :  { %v170_v30 = vsub.f32 %v154_v18, %v163_v28  ;;  %v168_v31 = vrot.slane %v167_v29, 1 }
 0x193   :  { %v172_v32 = vmul.f32 1.442695, %v170_v30  ;;  %v169_v33 = vmax.f32 %v167_v29, %v168_v31 }
 0x195   :  { %261 = vpow2.f32 %v172_v32  ;;  %v171_v34 = vsub.f32 %v157_v21, %v169_v33 }
 0x197   :  { %v174_v35 = vmul.f32 1.442695, %v171_v34 }
 0x199   :  { %263 = vpow2.f32 %v174_v35 }
 0x1a2   :  { %v262_v36 = vpop.eup %261 }
 0x1a3   :  { %v176_v37 = vrot.slane %v262_v36, 4 }
 0x1a5   :  { %v177_v38 = vadd.f32 %v262_v36, %v176_v37 }
 0x1a6   :  { %v264_v39 = vpop.eup %263 }
 0x1a7   :  { %v182_v40 = vrot.slane %v264_v39, 4  ;;  %v178_v41 = vrot.slane %v177_v38, 2 }
 0x1a9   :  { %v183_v42 = vadd.f32 %v264_v39, %v182_v40  ;;  %v179_v43 = vadd.f32 %v178_v41, %v177_v38 }
 0x1ab   :  { %v180_v44 = vrot.slane %v179_v43, 1  ;;  %v184_v45 = vrot.slane %v183_v42, 2 }
 0x1ad   :  { %v181_v46 = vadd.f32 %v180_v44, %v179_v43  ;;  %v185_v47 = vadd.f32 %v184_v45, %v183_v42 }
 0x1af   :  { %v186_v48 = vrot.slane %v185_v47, 1  ;;  %265 = vrcp.f32 %v181_v46 }
 0x1b1   :  { %v187_v49 = vadd.f32 %v186_v48, %v185_v47 }
 0x1b3   :  { %267 = vrcp.f32 %v187_v49 }
 0x1bc   :  { %v266_v50 = vpop.eup %265 }
 0x1bd   :  { %v190_v51 = vmul.f32 %v266_v50, %v262_v36 }
 0x1bf   :  { %v192_v52 = vmul.f32 %v190_v51, %v371_v2 }
 0x1c0   :  { %v268_v53 = vpop.eup %267 }
 0x1c1   :  { %v191_v54 = vmul.f32 %v268_v53, %v264_v39  ;;  %v194_v55 = vsel %vm59_vm0, %v192_v52, 0.0 }
 0x1c2   :  { %v195_v56 = vrot.slane %v194_v55, 4 }
 0x1c3   :  { %v193_v57 = vmul.f32 %v191_v54, %v375_v5 }
 0x1c4   :  { %v196_v58 = vadd.f32 %v195_v56, %v194_v55 }
 0x1c5   :  { %v201_v59 = vsel %vm59_vm0, %v193_v57, 0.0 }
 0x1c6   :  { %v197_v60 = vrot.slane %v196_v58, 2  ;;  %v202_v61 = vrot.slane %v201_v59, 4 }
 0x1c8   :  { %v198_v62 = vadd.f32 %v197_v60, %v196_v58  ;;  %v203_v63 = vadd.f32 %v202_v61, %v201_v59 }
 0x1ca   :  { %v204_v0 = vrot.slane %v203_v63, 2  ;;  %v199_v1 = vrot.slane %v198_v62, 1 }
 0x1cc   :  { %v205_v3 = vadd.f32 %v204_v0, %v203_v63  ;;  %v200_v2 = vadd.f32 %v199_v1, %v198_v62 }
 0x1ce   :  { %v206_v4 = vrot.slane %v205_v3, 1 }
 0x1d0   :  { %v207_v6 = vadd.f32 %v206_v4, %v205_v3 }
 0x1d2   :  { %v211_v7 = vsel %vm210_vm1, %v207_v6, %v200_v2 }
 0x1d3   :  { %214 = vst.msk [vmem:[#allocation7] sm:$0x3] %vm213_vm2, %v211_v7 }
 0x1d4   :  { %320 = shalt.err (!%p317_p0)
}
 0x1d5   :  { %224 = dma.vmem_to_hbm [thread:$0]  %s222_s3, 32, %s398_s4, [#allocation4]  }
 0x1d6   :  { %333 = dma.done.wait [#allocation4], 32  }
 0x1d7   :  { %334 = vsyncadd [#allocation4], 4294967264 }
 0x1d8   :  { %228 = vsyncpa [#allocation3], 1 }
 0x1d9   :  { %229 = vsyncpa [#allocation6], 1 }
 0x1da   :  { %230 = vsyncpa [#allocation4], 1 }

</bundles_post_ra>
